<compile_context>
chip_gen: v7x
topology: tpu7x:2x2x1
jax: 0.10.0
libtpu: 0.0.40
codegen_flags: <defaults>
</compile_context>

<pallas_src>
import functools

import jax
import jax.numpy as jnp
from jax.experimental import pallas as pl
from jax.experimental.pallas import tpu as pltpu


def _pos_embed_rel_kernel(q_ref, rbd_ref, out_ref):
    # q_ref:   (TILE_B, HW*dim)        one row per (B*BB) halo block
    # rbd_ref: (HW*dim, HW*win^2)      fused gather + rel-proj + broadcast-add table
    # out_ref: (TILE_B, HW*win^2)      lane-dense relative-logit rows
    out_ref[...] = jnp.dot(
        q_ref[...], rbd_ref[...], preferred_element_type=jnp.float32
    ).astype(out_ref.dtype)


def _build_rbd(height_rel, width_rel, block_size, dtype):
    """Block-diagonal fused RHS. Depends only on the parameters (cacheable)."""
    rel_size, dim = height_rel.shape
    win = (rel_size + 1) // 2
    win2 = win * win
    H = W = block_size
    HW = H * W

    pos = jnp.arange(HW, dtype=jnp.int32)
    h = pos // W                                           # (HW,)
    w = pos % W                                            # (HW,)
    k = jnp.arange(win, dtype=jnp.int32)
    hidx = (win - 1) + k[None, :] - h[:, None]             # (HW, win) in [0, rel)
    widx = (win - 1) + k[None, :] - w[:, None]             # (HW, win) in [0, rel)

    hg = height_rel[hidx]                                  # (HW, win, dim)
    wg = width_rel[widx]                                   # (HW, win, dim)
    r = hg[:, :, None, :] + wg[:, None, :, :]              # (HW, win_i, win_j, dim)
    r = jnp.transpose(r, (0, 3, 1, 2)).reshape(HW, dim, win2)

    eye = jnp.eye(HW, dtype=r.dtype)
    rbd = jnp.einsum('pq,pdk->pdqk', eye, r)               # (HW, dim, HW, win2)
    return rbd.reshape(HW * dim, HW * win2).astype(dtype)


def _choose_tile(n_pad):
    # Prefer >= 2 grid steps (v7x megacore) while keeping tiles big (amortize
    # per-step overhead) and sublane-aligned (multiple of 8), dividing n_pad.
    if n_pad <= 8:
        return n_pad
    tile = min(256, max(8, (n_pad // 2 // 8) * 8))
    while n_pad % tile:
        tile -= 8
    return tile


@functools.partial(jax.jit, static_argnums=(3,))
def pos_embed_rel(q, height_rel, width_rel, block_size):
    """q: (B, BB, HW, dim_head)  ->  (B, BB, HW, win_size**2)"""
    B, BB, HW, dim = q.shape
    H = W = block_size
    assert HW == H * W
    rel_size = height_rel.shape[0]
    win = (rel_size + 1) // 2
    win2 = win * win
    # Halo attention always has win_size >= block_size; needed so the gather
    # index win-1+k-pos stays inside [0, rel_size).
    assert win >= block_size

    dtype = q.dtype
    N = B * BB

    rbd = _build_rbd(height_rel, width_rel, block_size, dtype)   # (HW*dim, HW*win2)

    # VMEM budget guard: Rbd must stay resident (constant index_map -> 1 buffer)
    # plus double-buffered q/out tiles, all well under the 32 MiB scoped default.
    rbd_bytes = HW * dim * HW * win2 * jnp.dtype(dtype).itemsize
    assert rbd_bytes <= (12 << 20), (
        "Rbd too large for the fused single-matmul variant; use a per-axis variant."
    )

    # Flatten: row per halo block, lanes = HW*dim (matches Rbd row index p*dim+d).
    q2 = q.reshape(N, HW * dim)
    n_pad = ((N + 7) // 8) * 8
    if n_pad != N:
        q2 = jnp.pad(q2, ((0, n_pad - N), (0, 0)))
    tile_b = _choose_tile(n_pad)
    grid = (n_pad // tile_b,)

    grid_spec = pltpu.PrefetchScalarGridSpec(
        num_scalar_prefetch=0,
        grid=grid,
        in_specs=[
            pl.BlockSpec((tile_b, HW * dim), lambda n: (n, 0)),
            pl.BlockSpec((HW * dim, HW * win2), lambda n: (0, 0)),
        ],
        out_specs=pl.BlockSpec((tile_b, HW * win2), lambda n: (n, 0)),
    )
    itemsize = jnp.dtype(dtype).itemsize
    cost = pl.CostEstimate(
        flops=2 * n_pad * (HW * dim) * (HW * win2),
        transcendentals=0,
        bytes_accessed=(n_pad * HW * dim + HW * dim * HW * win2
                        + n_pad * HW * win2) * itemsize,
    )
    out = pl.pallas_call(
        _pos_embed_rel_kernel,
        out_shape=jax.ShapeDtypeStruct((n_pad, HW * win2), dtype),
        grid_spec=grid_spec,
        compiler_params=pltpu.CompilerParams(dimension_semantics=("parallel",)),
        cost_estimate=cost,
    )(q2, rbd)

    return out[:N].reshape(B, BB, HW, win2)


# ---------------- pure-JAX reference (direct port of the PyTorch code) ----------------
def _rel_logits_1d_ref(q, rel_k, permute_mask):
    B, H, W, dim = q.shape
    rel_size = rel_k.shape[0]
    win_size = (rel_size + 1) // 2
    x = jnp.einsum('bhwd,rd->bhwr', q, rel_k)
    x = x.reshape(-1, W, rel_size)
    x_pad = jnp.pad(x, ((0, 0), (0, 0), (0, 1))).reshape(x.shape[0], -1)
    x_pad = jnp.pad(x_pad, ((0, 0), (0, rel_size - W)))
    x_pad = x_pad.reshape(-1, W + 1, rel_size)
    x = x_pad[:, :W, win_size - 1:]
    x = x.reshape(B, H, 1, W, win_size)
    x = jnp.broadcast_to(x, (B, H, win_size, W, win_size))
    return jnp.transpose(x, permute_mask)


def pos_embed_rel_ref(q, height_rel, width_rel, block_size, dim_head):
    B, BB, HW, _ = q.shape
    q4 = q.reshape(-1, block_size, block_size, dim_head)
    rel_logits_w = _rel_logits_1d_ref(q4, width_rel, (0, 1, 3, 2, 4))
    q4t = jnp.transpose(q4, (0, 2, 1, 3))
    rel_logits_h = _rel_logits_1d_ref(q4t, height_rel, (0, 3, 1, 4, 2))
    rel_logits = rel_logits_h + rel_logits_w
    return rel_logits.reshape(B, BB, HW, -1)


if __name__ == "__main__":
    # Module config (halo-attention style: win_size = block_size + 2*halo).
    block_size = 4
    win_size = 6
    dim_head = 16
    scale = dim_head ** -0.5
    B, BB = 2, 8                      # N = 16 halo blocks -> grid of 2 parallel steps
    HW = block_size * block_size

    key = jax.random.PRNGKey(0)
    kq, kh, kw = jax.random.split(key, 3)
    q = jax.random.normal(kq, (B, BB, HW, dim_head), dtype=jnp.float32)
    # Deterministic parameter init, mirroring torch.randn(2*win-1, dim) * scale.
    height_rel = jax.random.normal(kh, (2 * win_size - 1, dim_head), dtype=jnp.float32) * scale
    width_rel = jax.random.normal(kw, (2 * win_size - 1, dim_head), dtype=jnp.float32) * scale

    out = pos_embed_rel(q, height_rel, width_rel, block_size)
    out = jax.block_until_ready(out)

    ref = pos_embed_rel_ref(q, height_rel, width_rel, block_size, dim_head)
    assert out.shape == (B, BB, HW, win_size * win_size)
    assert jnp.allclose(out, ref, atol=1e-5, rtol=1e-5), "mismatch vs reference"
    print("KERNEL_OK")
</pallas_src>

<mosaic_0001>
module attributes {stable_mosaic.version = 11 : i64} {
  func.func @_pos_embed_rel_kernel(%arg0: i32, %arg1: memref<8x256xf32, #tpu.memory_space<vmem>>, %arg2: memref<256x576xf32, #tpu.memory_space<vmem>>, %arg3: memref<8x576xf32, #tpu.memory_space<vmem>>) attributes {dimension_semantics = [#tpu.dimension_semantics<parallel>], iteration_bounds = array<i64: 2>, scalar_prefetch = 0 : i64, scratch_operands = 0 : i64, tpu.core_type = #tpu.core_type<tc>, window_params = [{transform_indices = @transform_0, window_bounds = array<i64: 8, 256>}, {pipeline_mode = #tpu.pipeline_mode<synchronous>, transform_indices = @transform_1, window_bounds = array<i64: 256, 576>}, {transform_indices = @transform_2, window_bounds = array<i64: 8, 576>}]} {
    %c0 = arith.constant 0 : index
    %c0_0 = arith.constant 0 : index
    %0 = vector.load %arg1[%c0, %c0_0] : memref<8x256xf32, #tpu.memory_space<vmem>>, vector<8x256xf32>
    %c0_1 = arith.constant 0 : index
    %c0_2 = arith.constant 0 : index
    %1 = vector.load %arg2[%c0_1, %c0_2] : memref<256x576xf32, #tpu.memory_space<vmem>>, vector<256x576xf32>
    %cst = arith.constant dense<0.000000e+00> : vector<8x576xf32>
    %2 = tpu.matmul %0, %1, %cst {dimension_numbers = #tpu.dot_dimension_numbers<[1], [0], [0], [1], [0, 0, 1, 1], [], []>} : vector<8x256xf32>, vector<256x576xf32>, vector<8x576xf32> -> vector<8x576xf32>
    %c0_3 = arith.constant 0 : index
    %c0_4 = arith.constant 0 : index
    %3 = vector.load %arg3[%c0_3, %c0_4] : memref<8x576xf32, #tpu.memory_space<vmem>>, vector<8x576xf32>
    tpu.vector_store %arg3[%c0_3, %c0_4], %2 {strides = array<i32>} : memref<8x576xf32, #tpu.memory_space<vmem>>, vector<8x576xf32>,
    return
  }
  func.func @transform_0(%arg0: i32) -> (i32, i32) {
    %c0_i32 = arith.constant 0 : i32
    %c0_i32_0 = arith.constant 0 : i32
    return %arg0, %c0_i32 : i32, i32
  }
  func.func @transform_1(%arg0: i32) -> (i32, i32) {
    %c0_i32 = arith.constant 0 : i32
    %c0_i32_0 = arith.constant 0 : i32
    %c0_i32_1 = arith.constant 0 : i32
    return %c0_i32, %c0_i32_0 : i32, i32
  }
  func.func @transform_2(%arg0: i32) -> (i32, i32) {
    %c0_i32 = arith.constant 0 : i32
    %c0_i32_0 = arith.constant 0 : i32
    return %arg0, %c0_i32 : i32, i32
  }
}

</mosaic_0001>

<bundles_post_ra>
// kernel: pos_embed_rel.1
= control target key start
LH: loop header
LB: loop body
LE: loop exit
PB: predicated region body
PF: predicated region fallthrough
CT: control target
= control target key end

     0   :  { %s817_s9 = smov 0   ;;  %s1342_s0 = inlined_call_operand.vmem [shape: f32[16,256], index: 0, kind: input, shape index: {}]   ;;  %s1343_s1 = inlined_call_operand.vmem [shape: f32[256,576], index: 1, kind: input, shape index: {}]   ;;  %s1344_s2 = inlined_call_operand.vmem [shape: f32[16,576], index: 2, kind: output, shape index: {}]  }
   0x1 LB: > { %s579_s10 = sadd.s32 4294967295, %s800_s9   ;;  %p583_p0 = scmp.ge.s32.totalorder %s800_s9, 1  ;;  %s800_s9 = sphi %s817_s9, %s12_s9  }
   0x2   : > { %p112_p1 = scmp.lt.s32.totalorder %s800_s9, 3 }
   0x4   : > { %p113_p2 = pnand %p583_p0, %p112_p1 }
   0x5   : > { %v147_v0 = vld [vmem:[%s1343_s1 + $0x8] sm:$0xff] (!%p113_p2)  ;;  %v152_v1 = vld [vmem:[%s1343_s1 + $0x30] sm:$0xff] (!%p113_p2)  ;;  %v146_v2 = vld [vmem:[%s1343_s1] sm:$0xff] (!%p113_p2)  ;;  %p941_p3 = scmp.lt.s32.totalorder (!%p113_p2), %s579_s10, 1  ;;  %vm522_vm0 = vcmask (!%p113_p2), 523264  }
   0x6   : > { %116 = sbr.rel (%p113_p2) target bundleno = 320 (0x140), region = 28  ;;  %v625_v3 = vpack.c.bf16 (!%p113_p2), %v152_v1, %v147_v0  ;;  %v151_v4 = vld [vmem:[%s1343_s1 + $0x28] sm:$0xff] (!%p113_p2)  ;;  %v157_v5 = vld [vmem:[%s1343_s1 + $0x58] sm:$0xff] (!%p113_p2)  ;;  %v162_v6 = vld [vmem:[%s1343_s1 + $0x80] sm:$0xff] (!%p113_p2) }
   0x7   : > { %v627_v7 = vpack.c.bf16 (!%p113_p2), %v151_v4, %v146_v2  ;;  %v629_v8 = vpack.c.bf16 (!%p113_p2), %v162_v6, %v157_v5  ;;  %v156_v9 = vld [vmem:[%s1343_s1 + $0x50] sm:$0xff] (!%p113_p2)  ;;  %v161_v10 = vld [vmem:[%s1343_s1 + $0x78] sm:$0xff] (!%p113_p2)  ;;  %v167_v11 = vld [vmem:[%s1343_s1 + $0xa8] sm:$0xff] (!%p113_p2) }
   0x8   : > { %626 = vmatprep.subr.bf16.mxu0 (!%p113_p2), %v625_v3  ;;  %v172_v12 = vld [vmem:[%s1343_s1 + $0xd0] sm:$0xff] (!%p113_p2)  ;;  %v631_v13 = vpack.c.bf16 (!%p113_p2), %v161_v10, %v156_v9  ;;  %v166_v15 = vld [vmem:[%s1343_s1 + $0xa0] sm:$0xff] (!%p113_p2)  ;;  %v171_v16 = vld [vmem:[%s1343_s1 + $0xc8] sm:$0xff] (!%p113_p2) }
   0x9   : > { %628 = vmatpush1.bf16.msra.mxu0 (!%p113_p2), %v627_v7  ;;  %v633_v14 = vpack.c.bf16 (!%p113_p2), %v172_v12, %v167_v11  ;;  %v177_v17 = vld [vmem:[%s1343_s1 + $0xf8] sm:$0xff] (!%p113_p2)  ;;  %v182_v18 = vld [vmem:[%s1343_s1 + $0x120] sm:$0xff] (!%p113_p2)  ;;  %v635_v19 = vpack.c.bf16 (!%p113_p2), %v171_v16, %v166_v15  ;;  %v176_v21 = vld [vmem:[%s1343_s1 + $0xf0] sm:$0xff] (!%p113_p2) }
   0xa   : > { %630 = vmatprep.subr.bf16.mxu0 (!%p113_p2), %v629_v8  ;;  %v637_v20 = vpack.c.bf16 (!%p113_p2), %v182_v18, %v177_v17  ;;  %v181_v22 = vld [vmem:[%s1343_s1 + $0x118] sm:$0xff] (!%p113_p2)  ;;  %v187_v23 = vld [vmem:[%s1343_s1 + $0x148] sm:$0xff] (!%p113_p2)  ;;  %v192_v24 = vld [vmem:[%s1343_s1 + $0x170] sm:$0xff] (!%p113_p2) }
   0xb   : > { %v639_v25 = vpack.c.bf16 (!%p113_p2), %v181_v22, %v176_v21  ;;  %v149_v26 = vld [vmem:[%s1343_s1 + $0x18] sm:$0xff] (!%p113_p2)  ;;  %v154_v27 = vld [vmem:[%s1343_s1 + $0x40] sm:$0xff] (!%p113_p2)  ;;  %v148_v28 = vld [vmem:[%s1343_s1 + $0x10] sm:$0xff] (!%p113_p2)  ;;  %v641_v29 = vpack.c.bf16 (!%p113_p2), %v192_v24, %v187_v23 }
   0xc   : > { %v186_v30 = vld [vmem:[%s1343_s1 + $0x140] sm:$0xff] (!%p113_p2)  ;;  %v191_v31 = vld [vmem:[%s1343_s1 + $0x168] sm:$0xff] (!%p113_p2)  ;;  %v689_v32 = vpack.c.bf16 (!%p113_p2), %v154_v27, %v149_v26  ;;  %v153_v33 = vld [vmem:[%s1343_s1 + $0x38] sm:$0xff] (!%p113_p2) }
   0xd   : > { %632 = vmatpush1.bf16.msra.mxu0 %v631_v13  ;;  %v197_v34 = vld [vmem:[%s1343_s1 + $0x198] sm:$0xff]  ;;  %v202_v35 = vld [vmem:[%s1343_s1 + $0x1c0] sm:$0xff]  ;;  %v691_v36 = vpack.c.bf16 %v153_v33, %v148_v28  ;;  %v159_v37 = vld [vmem:[%s1343_s1 + $0x68] sm:$0xff]  ;;  %v643_v41 = vpack.c.bf16 %v191_v31, %v186_v30  ;;  %s1347_s10 = smov (!%p941_p3, %s579_s10), 1 }
   0xe   : > { %634 = vmatprep.subr.bf16.mxu0 %v633_v14  ;;  %690 = vmatprep.subr.bf16.mxu1 %v689_v32  ;;  %v164_v38 = vld [vmem:[%s1343_s1 + $0x90] sm:$0xff]  ;;  %v158_v39 = vld [vmem:[%s1343_s1 + $0x60] sm:$0xff]  ;;  %v163_v40 = vld [vmem:[%s1343_s1 + $0x88] sm:$0xff]  ;;  %v645_v46 = vpack.c.bf16 %v202_v35, %v197_v34  ;;  %s589_s20 = sshll.u32 %s1347_s10, 4  ;;  %s785_s28 = smul.u32 40, %s1347_s10 }
   0xf   : > { %v196_v42 = vld [vmem:[%s1343_s1 + $0x190] sm:$0xff]  ;;  %v201_v43 = vld [vmem:[%s1343_s1 + $0x1b8] sm:$0xff]  ;;  %692 = vmatpush1.bf16.msra.mxu1 %v691_v36  ;;  %v693_v44 = vpack.c.bf16 %v164_v38, %v159_v37  ;;  %v695_v45 = vpack.c.bf16 %v163_v40, %v158_v39  ;;  %v207_v47 = vld [vmem:[%s1343_s1 + $0x1e8] sm:$0xff]  ;;  %s1024_s5 = scalar_lea.vmem %s1342_s0, %s589_s20 }
  0x10   : > { %v169_v48 = vld [vmem:[%s1343_s1 + $0xb8] sm:$0xff]  ;;  %v174_v49 = vld [vmem:[%s1343_s1 + $0xe0] sm:$0xff]  ;;  %v212_v50 = vld [vmem:[%s1343_s1 + $0x210] sm:$0xff]  ;;  %v647_v54 = vpack.c.bf16 %v201_v43, %v196_v42  ;;  %s143_s3 = scalar_lea.vmem %s1344_s2, %s785_s28 }
  0x11   : > { %636 = vmatpush1.bf16.msra.mxu0 %v635_v19  ;;  %694 = vmatprep.subr.bf16.mxu1 %v693_v44  ;;  %v697_v51 = vpack.c.bf16 %v174_v49, %v169_v48  ;;  %v168_v52 = vld [vmem:[%s1343_s1 + $0xb0] sm:$0xff]  ;;  %v173_v53 = vld [vmem:[%s1343_s1 + $0xd8] sm:$0xff]  ;;  %v206_v55 = vld [vmem:[%s1343_s1 + $0x1e0] sm:$0xff]  ;;  %v649_v59 = vpack.c.bf16 %v212_v50, %v207_v47 }
  0x12   : > { %638 = vmatprep.subr.bf16.mxu0 %v637_v20  ;;  %v699_v56 = vpack.c.bf16 %v173_v53, %v168_v52  ;;  %v179_v57 = vld [vmem:[%s1343_s1 + $0x108] sm:$0xff]  ;;  %v184_v58 = vld [vmem:[%s1343_s1 + $0x130] sm:$0xff]  ;;  %v178_v62 = vld [vmem:[%s1343_s1 + $0x100] sm:$0xff] }
  0x13   : > { %696 = vmatpush1.bf16.msra.mxu1 %v695_v45  ;;  %v211_v60 = vld [vmem:[%s1343_s1 + $0x208] sm:$0xff]  ;;  %v701_v61 = vpack.c.bf16 %v184_v58, %v179_v57  ;;  %v217_v0 = vld [vmem:[%s1343_s1 + $0x238] sm:$0xff]  ;;  %v222_v1 = vld [vmem:[%s1343_s1 + $0x260] sm:$0xff] }
  0x14   : > { %698 = vmatprep.subr.bf16.mxu1 %v697_v51  ;;  %v183_v63 = vld [vmem:[%s1343_s1 + $0x128] sm:$0xff]  ;;  %v189_v2 = vld [vmem:[%s1343_s1 + $0x158] sm:$0xff]  ;;  %v194_v3 = vld [vmem:[%s1343_s1 + $0x180] sm:$0xff]  ;;  %v651_v4 = vpack.c.bf16 %v211_v60, %v206_v55  ;;  %v653_v8 = vpack.c.bf16 %v222_v1, %v217_v0 }
  0x15   : > { %640 = vmatpush1.bf16.msra.mxu0 %v639_v25  ;;  %v216_v5 = vld [vmem:[%s1343_s1 + $0x230] sm:$0xff]  ;;  %v221_v6 = vld [vmem:[%s1343_s1 + $0x258] sm:$0xff]  ;;  %v703_v7 = vpack.c.bf16 %v183_v63, %v178_v62  ;;  %v227_v9 = vld [vmem:[%s1343_s1 + $0x288] sm:$0xff]  ;;  %v705_v10 = vpack.c.bf16 %v194_v3, %v189_v2 }
  0x16   : > { %642 = vmatprep.subr.bf16.mxu0 %v641_v29  ;;  %v188_v11 = vld [vmem:[%s1343_s1 + $0x150] sm:$0xff]  ;;  %v193_v12 = vld [vmem:[%s1343_s1 + $0x178] sm:$0xff]  ;;  %v199_v14 = vld [vmem:[%s1343_s1 + $0x1a8] sm:$0xff]  ;;  %v655_v16 = vpack.c.bf16 %v221_v6, %v216_v5 }
  0x17   : > { %700 = vmatpush1.bf16.msra.mxu1 %v699_v56  ;;  %v232_v13 = vld [vmem:[%s1343_s1 + $0x2b0] sm:$0xff]  ;;  %v226_v17 = vld [vmem:[%s1343_s1 + $0x280] sm:$0xff]  ;;  %v231_v18 = vld [vmem:[%s1343_s1 + $0x2a8] sm:$0xff]  ;;  %v707_v19 = vpack.c.bf16 %v193_v12, %v188_v11 }
  0x18   : > { %702 = vmatprep.subr.bf16.mxu1 %v701_v61  ;;  %v204_v15 = vld [vmem:[%s1343_s1 + $0x1d0] sm:$0xff]  ;;  %v657_v20 = vpack.c.bf16 %v232_v13, %v227_v9  ;;  %v237_v21 = vld [vmem:[%s1343_s1 + $0x2d8] sm:$0xff]  ;;  %v198_v23 = vld [vmem:[%s1343_s1 + $0x1a0] sm:$0xff]  ;;  %v659_v28 = vpack.c.bf16 %v231_v18, %v226_v17 }
  0x19   : > { %644 = vmatpush1.bf16.msra.mxu0 %v643_v41  ;;  %v709_v22 = vpack.c.bf16 %v204_v15, %v199_v14  ;;  %v203_v24 = vld [vmem:[%s1343_s1 + $0x1c8] sm:$0xff]  ;;  %v242_v25 = vld [vmem:[%s1343_s1 + $0x300] sm:$0xff]  ;;  %v209_v26 = vld [vmem:[%s1343_s1 + $0x1f8] sm:$0xff] }
  0x1a   : > { %646 = vmatprep.subr.bf16.mxu0 %v645_v46  ;;  %v214_v27 = vld [vmem:[%s1343_s1 + $0x220] sm:$0xff]  ;;  %v236_v29 = vld [vmem:[%s1343_s1 + $0x2d0] sm:$0xff]  ;;  %v241_v30 = vld [vmem:[%s1343_s1 + $0x2f8] sm:$0xff]  ;;  %v711_v31 = vpack.c.bf16 %v203_v24, %v198_v23  ;;  %v661_v33 = vpack.c.bf16 %v242_v25, %v237_v21 }
  0x1b   : > { %704 = vmatpush1.bf16.msra.mxu1 %v703_v7  ;;  %v1042_v32 = vld [vmem:[%s1024_s5 + $0x8] sm:$0xff]  ;;  %v713_v35 = vpack.c.bf16 %v214_v27, %v209_v26  ;;  %v208_v36 = vld [vmem:[%s1343_s1 + $0x1f0] sm:$0xff]  ;;  %v213_v37 = vld [vmem:[%s1343_s1 + $0x218] sm:$0xff]  ;;  %v663_v41 = vpack.c.bf16 %v241_v30, %v236_v29 }
  0x1c   : > { %706 = vmatprep.subr.bf16.mxu1 %v705_v10  ;;  %v247_v34 = vld [vmem:[%s1343_s1 + $0x328] sm:$0xff]  ;;  %v252_v38 = vld [vmem:[%s1343_s1 + $0x350] sm:$0xff]  ;;  %370 = vmatprep.mubr.f32.mxu0 %v1042_v32  ;;  %v246_v42 = vld [vmem:[%s1343_s1 + $0x320] sm:$0xff]  ;;  %v715_v44 = vpack.c.bf16 %v213_v37, %v208_v36 }
  0x1d   : > { %648 = vmatpush1.bf16.msra.mxu0 %v647_v54  ;;  %v219_v39 = vld [vmem:[%s1343_s1 + $0x248] sm:$0xff]  ;;  %v224_v40 = vld [vmem:[%s1343_s1 + $0x270] sm:$0xff]  ;;  %441 = vmatprep.mubr.f32.mxu1 %v1042_v32  ;;  %v665_v45 = vpack.c.bf16 %v252_v38, %v247_v34  ;;  %v257_v46 = vld [vmem:[%s1343_s1 + $0x378] sm:$0xff] }
  0x1e   : > { %650 = vmatprep.subr.bf16.mxu0 %v649_v59  ;;  %v251_v43 = vld [vmem:[%s1343_s1 + $0x348] sm:$0xff]  ;;  %v717_v47 = vpack.c.bf16 %v224_v40, %v219_v39  ;;  %v218_v48 = vld [vmem:[%s1343_s1 + $0x240] sm:$0xff]  ;;  %v229_v51 = vld [vmem:[%s1343_s1 + $0x298] sm:$0xff] }
  0x1f   : > { %708 = vmatpush1.bf16.msra.mxu1 %v707_v19  ;;  %v223_v49 = vld [vmem:[%s1343_s1 + $0x268] sm:$0xff]  ;;  %v262_v50 = vld [vmem:[%s1343_s1 + $0x3a0] sm:$0xff]  ;;  %v667_v53 = vpack.c.bf16 %v251_v43, %v246_v42  ;;  %v256_v54 = vld [vmem:[%s1343_s1 + $0x370] sm:$0xff] }
  0x20   : > { %710 = vmatprep.subr.bf16.mxu1 %v709_v22  ;;  %v234_v52 = vld [vmem:[%s1343_s1 + $0x2c0] sm:$0xff]  ;;  %v261_v55 = vld [vmem:[%s1343_s1 + $0x398] sm:$0xff]  ;;  %v719_v56 = vpack.c.bf16 %v223_v49, %v218_v48  ;;  %v669_v57 = vpack.c.bf16 %v262_v50, %v257_v46  ;;  %v267_v58 = vld [vmem:[%s1343_s1 + $0x3c8] sm:$0xff] }
  0x21   : > { %652 = vmatpush1.bf16.msra.mxu0 %v651_v4  ;;  %v721_v59 = vpack.c.bf16 %v234_v52, %v229_v51  ;;  %v228_v60 = vld [vmem:[%s1343_s1 + $0x290] sm:$0xff]  ;;  %v233_v61 = vld [vmem:[%s1343_s1 + $0x2b8] sm:$0xff]  ;;  %v239_v63 = vld [vmem:[%s1343_s1 + $0x2e8] sm:$0xff]  ;;  %v671_v1 = vpack.c.bf16 %v261_v55, %v256_v54 }
  0x22   : > { %654 = vmatprep.subr.bf16.mxu0 %v653_v8  ;;  %v272_v62 = vld [vmem:[%s1343_s1 + $0x3f0] sm:$0xff]  ;;  %v266_v2 = vld [vmem:[%s1343_s1 + $0x3c0] sm:$0xff]  ;;  %v271_v3 = vld [vmem:[%s1343_s1 + $0x3e8] sm:$0xff]  ;;  %v723_v4 = vpack.c.bf16 %v233_v61, %v228_v60 }
  0x23   : > { %712 = vmatpush1.bf16.msra.mxu1 %v711_v31  ;;  %v244_v0 = vld [vmem:[%s1343_s1 + $0x310] sm:$0xff]  ;;  %v673_v5 = vpack.c.bf16 %v272_v62, %v267_v58  ;;  %v277_v6 = vld [vmem:[%s1343_s1 + $0x418] sm:$0xff]  ;;  %v238_v8 = vld [vmem:[%s1343_s1 + $0x2e0] sm:$0xff]  ;;  %v675_v13 = vpack.c.bf16 %v271_v3, %v266_v2 }
  0x24   : > { %714 = vmatprep.subr.bf16.mxu1 %v713_v35  ;;  %v725_v7 = vpack.c.bf16 %v244_v0, %v239_v63  ;;  %v243_v9 = vld [vmem:[%s1343_s1 + $0x308] sm:$0xff]  ;;  %v282_v10 = vld [vmem:[%s1343_s1 + $0x440] sm:$0xff]  ;;  %v249_v11 = vld [vmem:[%s1343_s1 + $0x338] sm:$0xff] }
  0x25   : > { %656 = vmatpush1.bf16.msra.mxu0 %v655_v16  ;;  %v254_v12 = vld [vmem:[%s1343_s1 + $0x360] sm:$0xff]  ;;  %v276_v14 = vld [vmem:[%s1343_s1 + $0x410] sm:$0xff]  ;;  %v281_v15 = vld [vmem:[%s1343_s1 + $0x438] sm:$0xff]  ;;  %v727_v16 = vpack.c.bf16 %v243_v9, %v238_v8  ;;  %v677_v17 = vpack.c.bf16 %v282_v10, %v277_v6 }
  0x26   : > { %658 = vmatprep.subr.bf16.mxu0 %v657_v20  ;;  %v287_v18 = vld [vmem:[%s1343_s1 + $0x468] sm:$0xff]  ;;  %v729_v19 = vpack.c.bf16 %v254_v12, %v249_v11  ;;  %v248_v20 = vld [vmem:[%s1343_s1 + $0x330] sm:$0xff]  ;;  %v253_v21 = vld [vmem:[%s1343_s1 + $0x358] sm:$0xff]  ;;  %v679_v25 = vpack.c.bf16 %v281_v15, %v276_v14 }
  0x27   : > { %716 = vmatpush1.bf16.msra.mxu1 %v715_v44  ;;  %v292_v22 = vld [vmem:[%s1343_s1 + $0x490] sm:$0xff]  ;;  %v259_v23 = vld [vmem:[%s1343_s1 + $0x388] sm:$0xff]  ;;  %v286_v26 = vld [vmem:[%s1343_s1 + $0x460] sm:$0xff] }
  0x28   : > { %718 = vmatprep.subr.bf16.mxu1 %v717_v47  ;;  %v264_v24 = vld [vmem:[%s1343_s1 + $0x3b0] sm:$0xff]  ;;  %v291_v27 = vld [vmem:[%s1343_s1 + $0x488] sm:$0xff]  ;;  %v681_v29 = vpack.c.bf16 %v292_v22, %v287_v18  ;;  %v297_v30 = vld [vmem:[%s1343_s1 + $0x4b8] sm:$0xff] }
  0x29   : > { %660 = vmatpush1.bf16.msra.mxu0 %v659_v28  ;;  %v731_v28 = vpack.c.bf16 %v253_v21, %v248_v20  ;;  %v733_v31 = vpack.c.bf16 %v264_v24, %v259_v23  ;;  %v263_v34 = vld [vmem:[%s1343_s1 + $0x3a8] sm:$0xff]  ;;  %v302_v35 = vld [vmem:[%s1343_s1 + $0x4e0] sm:$0xff]  ;;  %v269_v36 = vld [vmem:[%s1343_s1 + $0x3d8] sm:$0xff]  ;;  %v683_v38 = vpack.c.bf16 %v291_v27, %v286_v26 }
  0x2a   : > { %662 = vmatprep.subr.bf16.mxu0 %v661_v33  ;;  %v258_v33 = vld [vmem:[%s1343_s1 + $0x380] sm:$0xff]  ;;  %v296_v39 = vld [vmem:[%s1343_s1 + $0x4b0] sm:$0xff]  ;;  %v301_v40 = vld [vmem:[%s1343_s1 + $0x4d8] sm:$0xff]  ;;  %v685_v42 = vpack.c.bf16 %v302_v35, %v297_v30 }
  0x2b   : > { %720 = vmatpush1.bf16.msra.mxu1 %v719_v56  ;;  %v274_v37 = vld [vmem:[%s1343_s1 + $0x400] sm:$0xff]  ;;  %v273_v46 = vld [vmem:[%s1343_s1 + $0x3f8] sm:$0xff]  ;;  %v235_v47 = vld [vmem:[%s1343_s1 + $0x2c8] sm:$0xff]  ;;  %v687_v50 = vpack.c.bf16 %v301_v40, %v296_v39 }
  0x2c   : > { %722 = vmatprep.subr.bf16.mxu1 %v721_v59  ;;  %v230_v43 = vld [vmem:[%s1343_s1 + $0x2a0] sm:$0xff]  ;;  %v737_v44 = vpack.c.bf16 %v274_v37, %v269_v36  ;;  %v279_v48 = vld [vmem:[%s1343_s1 + $0x428] sm:$0xff]  ;;  %v284_v49 = vld [vmem:[%s1343_s1 + $0x450] sm:$0xff] }
  0x2d   : > { %664 = vmatpush1.bf16.msra.mxu0 %v663_v41  ;;  %v735_v41 = vpack.c.bf16 %v263_v34, %v258_v33  ;;  %v150_v51 = vld [vmem:[%s1343_s1 + $0x20] sm:$0xff]  ;;  %v155_v52 = vld [vmem:[%s1343_s1 + $0x48] sm:$0xff]  ;;  %v753_v54 = vpack.c.bf16 %v235_v47, %v230_v43  ;;  %v240_v55 = vld [vmem:[%s1343_s1 + $0x2f0] sm:$0xff]  ;;  %v741_v56 = vpack.c.bf16 %v284_v49, %v279_v48 }
  0x2e   : > { %666 = vmatprep.subr.bf16.mxu0 %v665_v45  ;;  %v268_v45 = vld [vmem:[%s1343_s1 + $0x3d0] sm:$0xff]  ;;  %v283_v58 = vld [vmem:[%s1343_s1 + $0x448] sm:$0xff]  ;;  %v245_v59 = vld [vmem:[%s1343_s1 + $0x318] sm:$0xff]  ;;  %v755_v63 = vpack.c.bf16 %v155_v52, %v150_v51 }
  0x2f   : > { %724 = vmatpush1.bf16.msra.mxu1 %v723_v4  ;;  %v289_v60 = vld [vmem:[%s1343_s1 + $0x478] sm:$0xff]  ;;  %v294_v61 = vld [vmem:[%s1343_s1 + $0x4a0] sm:$0xff]  ;;  %v160_v0 = vld [vmem:[%s1343_s1 + $0x70] sm:$0xff]  ;;  %v757_v3 = vpack.c.bf16 %v245_v59, %v240_v55 }
  0x30   : > { %726 = vmatprep.subr.bf16.mxu1 %v725_v7  ;;  %v1233_v62 = vld [vmem:[%s1024_s5] sm:$0xff]  ;;  %v288_v6 = vld [vmem:[%s1343_s1 + $0x470] sm:$0xff]  ;;  %v293_v7 = vld [vmem:[%s1343_s1 + $0x498] sm:$0xff] }
  0x31   : > { %668 = vmatpush1.bf16.msra.mxu0 %v667_v53  ;;  %v739_v53 = vpack.c.bf16 %v273_v46, %v268_v45  ;;  %v250_v4 = vld [vmem:[%s1343_s1 + $0x340] sm:$0xff]  ;;  %v255_v8 = vld [vmem:[%s1343_s1 + $0x368] sm:$0xff]  ;;  %v304_v10 = vld [vmem:[%s1343_s1 + $0x4f0] sm:$0xff] }
  0x32   : > { %670 = vmatprep.subr.bf16.mxu0 %v669_v57  ;;  %v278_v57 = vld [vmem:[%s1343_s1 + $0x420] sm:$0xff]  ;;  %v299_v9 = vld [vmem:[%s1343_s1 + $0x4c8] sm:$0xff]  ;;  %v761_v14 = vpack.c.bf16 %v255_v8, %v250_v4  ;;  %v265_v20 = vld [vmem:[%s1343_s1 + $0x3b8] sm:$0xff] }
  0x33   : > { %728 = vmatpush1.bf16.msra.mxu1 %v727_v16  ;;  %v743_v2 = vpack.c.bf16 %v283_v58, %v278_v57  ;;  %v170_v12 = vld [vmem:[%s1343_s1 + $0xc0] sm:$0xff]  ;;  %v175_v15 = vld [vmem:[%s1343_s1 + $0xe8] sm:$0xff]  ;;  %v749_v16 = vpack.c.bf16 %v304_v10, %v299_v9  ;;  %v180_v24 = vld [vmem:[%s1343_s1 + $0x110] sm:$0xff] }
  0x34   : > { %730 = vmatprep.subr.bf16.mxu1 %v729_v19  ;;  %v303_v18 = vld [vmem:[%s1343_s1 + $0x4e8] sm:$0xff]  ;;  %v260_v19 = vld [vmem:[%s1343_s1 + $0x390] sm:$0xff]  ;;  %v763_v21 = vpack.c.bf16 %v175_v15, %v170_v12  ;;  %v270_v26 = vld [vmem:[%s1343_s1 + $0x3e0] sm:$0xff] }
  0x35   : > { %672 = vmatpush1.bf16.msra.mxu0 %v671_v1  ;;  %v165_v1 = vld [vmem:[%s1343_s1 + $0x98] sm:$0xff]  ;;  %v765_v23 = vpack.c.bf16 %v265_v20, %v260_v19  ;;  %v195_v30 = vld [vmem:[%s1343_s1 + $0x188] sm:$0xff]  ;;  %v200_v36 = vld [vmem:[%s1343_s1 + $0x1b0] sm:$0xff] }
  0x36   : > { %674 = vmatprep.subr.bf16.mxu0 %v673_v5  ;;  %v745_v5 = vpack.c.bf16 %v294_v61, %v289_v60  ;;  %v759_v11 = vpack.c.bf16 %v165_v1, %v160_v0  ;;  %v285_v33 = vld [vmem:[%s1343_s1 + $0x458] sm:$0xff]  ;;  %v295_v39 = vld [vmem:[%s1343_s1 + $0x4a8] sm:$0xff]  ;;  %v220_v48 = vld [vmem:[%s1343_s1 + $0x250] sm:$0xff] }
  0x37   : > { %732 = vmatpush1.bf16.msra.mxu1 %v731_v28  ;;  %v205_v37 = vld [vmem:[%s1343_s1 + $0x1d8] sm:$0xff]  ;;  %v215_v43 = vld [vmem:[%s1343_s1 + $0x228] sm:$0xff] }
  0x38   : > { %734 = vmatprep.subr.bf16.mxu1 %v733_v31  ;;  %v280_v31 = vld [vmem:[%s1343_s1 + $0x430] sm:$0xff]  ;;  %v775_v40 = vpack.c.bf16 %v205_v37, %v200_v36  ;;  %v305_v45 = vld [vmem:[%s1343_s1 + $0x4f8] sm:$0xff] }
  0x39   : > { %676 = vmatpush1.bf16.msra.mxu0 %v675_v13  ;;  %v747_v13 = vpack.c.bf16 %v293_v7, %v288_v6  ;;  %v773_v35 = vpack.c.bf16 %v285_v33, %v280_v31  ;;  %v225_v49 = vld [vmem:[%s1343_s1 + $0x278] sm:$0xff] }
  0x3a   : > { %678 = vmatprep.subr.bf16.mxu0 %v677_v17  ;;  %v298_v17 = vld [vmem:[%s1343_s1 + $0x4c0] sm:$0xff] }
  0x3b   : > { %736 = vmatpush1.bf16.msra.mxu1 %v735_v41  ;;  %v751_v22 = vpack.c.bf16 %v303_v18, %v298_v17 }
  0x3c   : > { %738 = vmatprep.subr.bf16.mxu1 %v737_v44  ;;  %v300_v44 = vld [vmem:[%s1343_s1 + $0x4d0] sm:$0xff] }
  0x3d   : > { %680 = vmatpush1.bf16.msra.mxu0 %v679_v25  ;;  %v185_v25 = vld [vmem:[%s1343_s1 + $0x138] sm:$0xff]  ;;  %v781_v47 = vpack.c.bf16 %v305_v45, %v300_v44 }
  0x3e   : > { %682 = vmatprep.subr.bf16.mxu0 %v681_v29  ;;  %v767_v27 = vpack.c.bf16 %v185_v25, %v180_v24  ;;  %v190_v29 = vld [vmem:[%s1343_s1 + $0x160] sm:$0xff] }
  0x3f   : > { %740 = vmatpush1.bf16.msra.mxu1 %v739_v53  ;;  %v771_v34 = vpack.c.bf16 %v195_v30, %v190_v29 }
  0x40   : > { %742 = vmatprep.subr.bf16.mxu1 %v741_v56 }
  0x41   : > { %684 = vmatpush1.bf16.msra.mxu0 %v683_v38  ;;  %v290_v38 = vld [vmem:[%s1343_s1 + $0x480] sm:$0xff] }
  0x42   : > { %686 = vmatprep.subr.bf16.mxu0 %v685_v42  ;;  %v777_v41 = vpack.c.bf16 %v295_v39, %v290_v38  ;;  %v210_v42 = vld [vmem:[%s1343_s1 + $0x200] sm:$0xff] }
  0x43   : > { %744 = vmatpush1.bf16.msra.mxu1 %v743_v2  ;;  %v779_v46 = vpack.c.bf16 %v215_v43, %v210_v42 }
  0x44   : > { %746 = vmatprep.subr.bf16.mxu1 %v745_v5 }
  0x45   : > { %688 = vmatpush1.bf16.msra.mxu0 %v687_v50  ;;  %v783_v50 = vpack.c.bf16 %v225_v49, %v220_v48 }
  0x46   : > { %754 = vmatprep.subr.bf16.mxu0 %v753_v54 }
  0x47   : > { %748 = vmatpush1.bf16.msra.mxu1 %v747_v13 }
  0x48   : > { %371 = vmatmul.mubr.f32.vlgmr.msra.gmra.mrb[0].mxu0 %v1233_v62  ;;  %750 = vmatprep.subr.bf16.mxu1 %v749_v16 }
  0x49   : > { %756 = vmatpush3.bf16.msra.mxu0 %v755_v63  ;;  %512 = vmatprep.mubr.f32.mxu0 %v1042_v32  ;;  %v275_v32 = vld [vmem:[%s1343_s1 + $0x408] sm:$0xff] }
  0x4a   : > { %758 = vmatprep.subr.bf16.mxu0 %v757_v3  ;;  %v769_v28 = vpack.c.bf16 %v275_v32, %v270_v26 }
  0x4b   : > { %752 = vmatpush1.bf16.msra.mxu1 %v751_v22 }
  0x4d   : > { %760 = vmatpush3.bf16.msra.mxu0 %v759_v11 }
  0x4e   : > { %762 = vmatprep.subr.bf16.mxu0 %v761_v14  ;;  %442 = vmatmul.mubr.f32.vlgmr.msra.gmra.mrb[0].mxu1 %v1233_v62 }
  0x51   : > { %764 = vmatpush3.bf16.msra.mxu0 %v763_v21 }
  0x52   : > { %766 = vmatprep.subr.bf16.mxu0 %v765_v23 }
  0x55   : > { %768 = vmatpush3.bf16.msra.mxu0 %v767_v27 }
  0x56   : > { %770 = vmatprep.subr.bf16.mxu0 %v769_v28 }
  0x59   : > { %772 = vmatpush3.bf16.msra.mxu0 %v771_v34 }
  0x5a   : > { %774 = vmatprep.subr.bf16.mxu0 %v773_v35 }
  0x5d   : > { %776 = vmatpush3.bf16.msra.mxu0 %v775_v40 }
  0x5e   : > { %778 = vmatprep.subr.bf16.mxu0 %v777_v41 }
  0x61   : > { %780 = vmatpush3.bf16.msra.mxu0 %v779_v46 }
  0x62   : > { %782 = vmatprep.subr.bf16.mxu0 %v781_v47 }
  0x65   : > { %784 = vmatpush3.bf16.msra.mxu0 %v783_v50 }
  0x68   : > { %513 = vmatmul.mubr.f32.vlgmr.msra.gmra.mrb[2].mxu0 %v1233_v62 }
 0x11b   : > { %v372_v51 = vpop.f32.mrb[0].mxu0 }
 0x11c   : > { %518 = vst [vmem:[%s143_s3] sm:$0xff] %v372_v51  ;;  %v374_v52 = vpop.f32.mrb[1].mxu0 }
 0x11d   : > { %519 = vst [vmem:[%s143_s3 + $0x8] sm:$0xff] %v374_v52 }
 0x121   : > { %v443_v53 = vpop.f32.mrb[0].mxu1 }
 0x122   : > { %520 = vst [vmem:[%s143_s3 + $0x10] sm:$0xff] %v443_v53  ;;  %v445_v54 = vpop.f32.mrb[1].mxu1 }
 0x123   : > { %521 = vst [vmem:[%s143_s3 + $0x18] sm:$0xff] %v445_v54 }
 0x13b   : > { %v622_v55 = vpop.f32.mrb[2].mxu0 }
 0x13c   : > { %v623_v56 = vpop.f32.mrb[3].mxu0 }
 0x13d   : > { %v624_v57 = vadd.f32 %v623_v56, %v622_v55 }
 0x13f   : > { %523 = vst.msk [vmem:[%s143_s3 + $0x20] sm:$0xff] %vm522_vm0, %v624_v57 }
 0x140 PF: > { %s12_s9 = sadd.s32 1, %s800_s9  }
 0x141   : > { %p9_p4 = scmp.ge.s32.totalorder %s12_s9, 4  }
 0x143   :  { %11 = sbr.rel (!%p9_p4) target bundleno = 1 (0x1), region = 58 }

</bundles_post_ra>
